<compile_context>
chip_gen: v7x
topology: tpu7x:2x2x1
jax: 0.10.0
libtpu: 0.0.40
codegen_flags: <defaults>
</compile_context>

<pallas_src>
from functools import partial

import jax
import jax.numpy as jnp
from jax.experimental import pallas as pl
from jax.experimental.pallas import tpu as pltpu

_LANE_CANDIDATES = (1024, 512, 256, 128)   # lane-dense widths (multiples of 128)
_SOFTPLUS_CLAMP = 20.0                     # PyTorch softplus threshold


def _mish_kernel(x_ref, o_ref):
    # Upcast to f32 for the transcendental (matters for bf16; no-op for f32).
    x = x_ref[...].astype(jnp.float32)
    # Clamp before exp so (1+e^x)^2 stays finite in f32; for x > 20 the result
    # rounds to exactly x, matching softplus(threshold=20) -> tanh ~= 1.0.
    e = jnp.exp(jnp.minimum(x, _SOFTPLUS_CLAMP))
    s = 1.0 + e
    t = 1.0 - 2.0 * pl.reciprocal(s * s + 1.0, approx=False)  # tanh(softplus(x))
    o_ref[...] = (x * t).astype(o_ref.dtype)


def _mish_jnp(x):
    # Same formulation, for the (<512-element) ragged tail only.
    xf = x.astype(jnp.float32)
    e = jnp.exp(jnp.minimum(xf, _SOFTPLUS_CLAMP))
    s = 1.0 + e
    t = 1.0 - 2.0 / (s * s + 1.0)
    return (xf * t).astype(x.dtype)


def _mish_2d(x2d: jax.Array, target_block_bytes: int) -> jax.Array:
    """Run the Mish kernel over a lane-dense (rows, lane) view."""
    rows, lane = x2d.shape
    itemsize = jnp.dtype(x2d.dtype).itemsize
    # Byte-budgeted block rows (~4 MiB per block, dtype-independent), rounded
    # down to a multiple of 8 sublanes; small arrays use a full-extent block.
    br = (target_block_bytes // (lane * itemsize)) // 8 * 8
    br = min(rows, max(8, br))
    n = rows * lane

    return pl.pallas_call(
        _mish_kernel,
        out_shape=jax.ShapeDtypeStruct((rows, lane), x2d.dtype),
        grid_spec=pltpu.PrefetchScalarGridSpec(
            num_scalar_prefetch=0,
            grid=(pl.cdiv(rows, br),),          # ragged last block: masked edge
            in_specs=[pl.BlockSpec((br, lane), lambda i: (i, 0))],
            out_specs=pl.BlockSpec((br, lane), lambda i: (i, 0)),
        ),
        compiler_params=pltpu.CompilerParams(
            # Shards grid steps across both TensorCores on v7x; no-op elsewhere.
            # TODO(synk): if a v7x profile shows one TC idle, switch to an
            # explicit core split (leading size-2 axis + CORE_PARALLEL).
            dimension_semantics=("parallel",),
            # 4 MiB blocks x 2 buffers x (in+out) = 16 MiB; raise the scoped
            # limit so this also fits v5e's 16 MiB default (safe on all gens).
            vmem_limit_bytes=32 * 1024 * 1024,
        ),
        cost_estimate=pl.CostEstimate(
            flops=6 * n,
            transcendentals=n,
            bytes_accessed=2 * n * itemsize,
        ),
    )(x2d)


@partial(jax.jit, static_argnames=("target_block_bytes",))
def mish(x: jax.Array, *, target_block_bytes: int = 4 * 1024 * 1024) -> jax.Array:
    """Elementwise Mish over any shape, computed in a Pallas TPU kernel."""
    orig_shape = x.shape
    n = x.size
    if n == 0:
        return x
    flat = x.reshape(-1)

    # Preferred path: an exact lane-dense factorisation -> no pad, no slice,
    # no extra HBM passes around the (opaque) pallas_call.
    lane = next((l for l in _LANE_CANDIDATES if n % l == 0), None)
    if lane is not None:
        out = _mish_2d(flat.reshape(n // lane, lane), target_block_bytes)
        return out.reshape(orig_shape)

    # Ragged fallback (n not a multiple of 128): kernel the divisible bulk,
    # compute the tiny tail with plain jnp, stitch with one concat.
    lane = 512
    n_bulk = (n // lane) * lane
    if n_bulk == 0:                 # fewer than 512 elements total
        return _mish_jnp(x)
    bulk = _mish_2d(flat[:n_bulk].reshape(n_bulk // lane, lane),
                    target_block_bytes).reshape(-1)
    tail = _mish_jnp(flat[n_bulk:])
    return jnp.concatenate([bulk, tail]).reshape(orig_shape)


def mish_reference(x: jax.Array) -> jax.Array:
    # Canonical PyTorch formulation: x * tanh(softplus(x)), threshold=20.
    sp = jnp.where(x > _SOFTPLUS_CLAMP, x,
                   jnp.log1p(jnp.exp(jnp.minimum(x, _SOFTPLUS_CLAMP))))
    return x * jnp.tanh(sp)


if __name__ == "__main__":
    key = jax.random.PRNGKey(0)
    # NCHW input, matching the PyTorch conv convention around this module.
    x = jax.random.normal(key, (2, 4, 16, 16), dtype=jnp.float32) * 3.0

    y = mish(x)
    jax.block_until_ready(y)

    y_ref = mish_reference(x)
    assert y.shape == x.shape and y.dtype == x.dtype
    assert jnp.allclose(y, y_ref, atol=1e-5, rtol=1e-5), "mismatch vs reference"

    # Ragged element count (not a multiple of 128) exercises the bulk+tail path.
    x2 = jax.random.normal(jax.random.PRNGKey(1), (3, 5, 47), dtype=jnp.float32) * 3.0
    y2 = mish(x2)
    jax.block_until_ready(y2)
    assert jnp.allclose(y2, mish_reference(x2), atol=1e-5, rtol=1e-5), "ragged mismatch"

    print("KERNEL_OK")
</pallas_src>

<mosaic_0001>
module attributes {stable_mosaic.version = 11 : i64} {
  func.func @_mish_kernel(%arg0: i32, %arg1: memref<2x1024xf32, #tpu.memory_space<vmem>>, %arg2: memref<2x1024xf32, #tpu.memory_space<vmem>>) attributes {dimension_semantics = [#tpu.dimension_semantics<parallel>], iteration_bounds = array<i64: 1>, scalar_prefetch = 0 : i64, scratch_operands = 0 : i64, tpu.core_type = #tpu.core_type<tc>, window_params = [{transform_indices = @transform_0, window_bounds = array<i64: 2, 1024>}, {transform_indices = @transform_1, window_bounds = array<i64: 2, 1024>}]} {
    %c0 = arith.constant 0 : index
    %c0_0 = arith.constant 0 : index
    %0 = vector.load %arg1[%c0, %c0_0] : memref<2x1024xf32, #tpu.memory_space<vmem>>, vector<2x1024xf32>
    %cst = arith.constant 2.000000e+01 : f32
    %1 = vector.broadcast %cst : f32 to vector<2x1024xf32>
    %2 = arith.minimumf %0, %1 : vector<2x1024xf32>
    %3 = math.exp %2 : vector<2x1024xf32>
    %cst_1 = arith.constant 1.000000e+00 : f32
    %4 = vector.broadcast %cst_1 : f32 to vector<2x1024xf32>
    %5 = arith.addf %4, %3 : vector<2x1024xf32>
    %6 = arith.mulf %5, %5 : vector<2x1024xf32>
    %cst_2 = arith.constant 1.000000e+00 : f32
    %7 = vector.broadcast %cst_2 : f32 to vector<2x1024xf32>
    %8 = arith.addf %6, %7 : vector<2x1024xf32>
    %9 = tpu.reciprocal %8 : vector<2x1024xf32> -> vector<2x1024xf32>
    %cst_3 = arith.constant 2.000000e+00 : f32
    %10 = vector.broadcast %cst_3 : f32 to vector<2x1024xf32>
    %11 = arith.mulf %10, %9 : vector<2x1024xf32>
    %cst_4 = arith.constant 1.000000e+00 : f32
    %12 = vector.broadcast %cst_4 : f32 to vector<2x1024xf32>
    %13 = arith.subf %12, %11 : vector<2x1024xf32>
    %14 = arith.mulf %0, %13 : vector<2x1024xf32>
    %c0_5 = arith.constant 0 : index
    %c0_6 = arith.constant 0 : index
    %15 = vector.load %arg2[%c0_5, %c0_6] : memref<2x1024xf32, #tpu.memory_space<vmem>>, vector<2x1024xf32>
    tpu.vector_store %arg2[%c0_5, %c0_6], %14 {strides = array<i32>} : memref<2x1024xf32, #tpu.memory_space<vmem>>, vector<2x1024xf32>,
    return
  }
  func.func @transform_0(%arg0: i32) -> (i32, i32) {
    %c0_i32 = arith.constant 0 : i32
    %c0_i32_0 = arith.constant 0 : i32
    return %arg0, %c0_i32 : i32, i32
  }
  func.func @transform_1(%arg0: i32) -> (i32, i32) {
    %c0_i32 = arith.constant 0 : i32
    %c0_i32_0 = arith.constant 0 : i32
    return %arg0, %c0_i32 : i32, i32
  }
}

</mosaic_0001>

<bundles_post_ra>
// kernel: mish.1
= control target key start
LH: loop header
LB: loop body
LE: loop exit
PB: predicated region body
PF: predicated region fallthrough
CT: control target
= control target key end

     0   :  { %s66_s0 = inlined_call_operand.vmem [shape: f32[2,1024], index: 0, kind: input, shape index: {}]   ;;  %s67_s1 = inlined_call_operand.vmem [shape: f32[2,1024], index: 1, kind: output, shape index: {}]  }
   0x1   :  { %v8_v0 = vld [vmem:[%s66_s0] sm:$0xff]  ;;  %v9_v1 = vld [vmem:[%s66_s0 + $0x8] sm:$0xff] }
   0x2   :  { %v10_v2 = vmin.f32 %v8_v0, 20.0  ;;  %v11_v3 = vmin.f32 %v9_v1, 20.0 }
   0x4   :  { %v12_v4 = vmul.f32 1.442695, %v10_v2  ;;  %v14_v5 = vmul.f32 1.442695, %v11_v3 }
   0x6   :  { %36 = vpow2.f32 %v12_v4 }
   0x7   :  { %38 = vpow2.f32 %v14_v5 }
  0x10   :  { %v37_v6 = vpop.eup %36 }
  0x11   :  { %v39_v7 = vpop.eup %38  ;;  %v16_v8 = vadd.f32 1.0, %v37_v6 }
  0x12   :  { %v17_v9 = vadd.f32 1.0, %v39_v7 }
  0x13   :  { %v18_v10 = vmul.f32 %v16_v8, %v16_v8 }
  0x14   :  { %v19_v11 = vmul.f32 %v17_v9, %v17_v9 }
  0x15   :  { %v20_v12 = vadd.f32 1.0, %v18_v10 }
  0x16   :  { %v21_v13 = vadd.f32 1.0, %v19_v11 }
  0x17   :  { %40 = vrcp.f32 %v20_v12 }
  0x18   :  { %42 = vrcp.f32 %v21_v13 }
  0x21   :  { %v41_v14 = vpop.eup %40 }
  0x22   :  { %v43_v15 = vpop.eup %42  ;;  %v24_v16 = vmul.f32 2.0, %v41_v14 }
  0x23   :  { %v25_v17 = vmul.f32 2.0, %v43_v15 }
  0x24   :  { %v26_v18 = vsub.f32 1.0, %v24_v16 }
  0x25   :  { %v27_v19 = vsub.f32 1.0, %v25_v17 }
  0x26   :  { %v28_v20 = vmul.f32 %v26_v18, %v8_v0 }
  0x27   :  { %v29_v21 = vmul.f32 %v27_v19, %v9_v1 }
  0x28   :  { %30 = vst [vmem:[%s67_s1] sm:$0xff] %v28_v20 }
  0x29   :  { %31 = vst [vmem:[%s67_s1 + $0x8] sm:$0xff] %v29_v21 }

</bundles_post_ra>
